<compile_context>
chip_gen: v7x
topology: tpu7x:2x2x1
jax: 0.10.0
libtpu: 0.0.40
codegen_flags: <defaults>
</compile_context>

<pallas_src>
import math

import jax
import jax.numpy as jnp
from jax.experimental import pallas as pl
from jax.experimental.pallas import tpu as pltpu

MEAN = 2.4
SCALE = 2.4
CONSTANT = -math.log(SCALE) - math.log(math.sqrt(2.0 * math.pi))
NEG_HALF_INV_VAR = -1.0 / (2.0 * SCALE * SCALE)  # precomputed: no runtime divide

_MIB = 1024 * 1024
_MAX_COLS = 1024  # lane-dense slab width upper bound


def _edm_weighting_kernel(gamma_ref, out_ref):
    # Compute in f32 even for 16-bit inputs: v5e's VPU/EUP have no bf16 path,
    # and bf16 intermediates through two exps drift past the 1e-5 tolerance.
    g = gamma_ref[...].astype(jnp.float32)
    d = g - MEAN
    data_part = d * d * NEG_HALF_INV_VAR
    pdf = jnp.exp(CONSTANT + data_part)
    # Matches the literal PyTorch formula (including inf*0=NaN for gamma << -88).
    out_ref[...] = (pdf * (jnp.exp(-g) + 0.25)).astype(out_ref.dtype)


def _cdiv(a: int, b: int) -> int:
    return -(-a // b)


def _round_up(x: int, m: int) -> int:
    return _cdiv(x, m) * m


def _choose_cols(total: int):
    """Largest slab width <= 1024 that divides `total` -> zero extra HBM passes.

    Prefer multiples of 128 (unmasked lane-dense stores); otherwise accept any
    divisor >= 128 (block last dim equals the full array dim, still copy-free).
    """
    for c in range(_MAX_COLS, 127, -128):
        if total % c == 0:
            return c
    for c in range(_MAX_COLS, 127, -1):
        if total % c == 0:
            return c
    return None


def _device_hints():
    try:
        kind = jax.devices()[0].device_kind.lower()
    except Exception:
        kind = ""
    if "v7" in kind:
        # 64 MiB VMEM, 2 TensorCores: 4 MiB tiles; ensure >=8 grid steps so the
        # "parallel" row axis shards across both cores and saturates HBM.
        return 4 * _MIB, 8
    # v5e / v6e: 128 MiB VMEM, 1 TensorCore: 8 MiB tiles, no step floor.
    return 8 * _MIB, 1


def _pick_tile_rows(rows, sub, cols, itemsize, tile_target_bytes, min_steps):
    if rows <= sub:
        return rows  # block equals full row dim; no sublane-multiple constraint
    cap = max(sub, (tile_target_bytes // (cols * itemsize)) // sub * sub)
    tr = min(cap, (rows // sub) * sub)  # multiple of `sub`, <= rows
    if min_steps > 1:
        per_step = max(sub, _round_up(_cdiv(rows, min_steps), sub))
        tr = min(tr, per_step)
    return max(tr, sub)


def edm_weighting(gamma: jax.Array) -> jax.Array:
    """Elementwise EDM weighting for arbitrarily shaped float `gamma`."""
    orig_shape = gamma.shape
    dtype = gamma.dtype
    total = int(gamma.size)
    if total == 0:
        return gamma

    flat = gamma.reshape(-1)  # free for contiguous inputs
    itemsize = jnp.dtype(dtype).itemsize
    sub = 8 * max(1, 4 // itemsize)  # 8 for f32, 16 for bf16/f16

    cols = _choose_cols(total)
    padded_total = total
    if cols is None:
        # Rare fallback (tiny arrays, or totals with no divisor in [128, 1024]):
        # pad into a 128-wide slab.  Costs one extra pass over in/out, but only
        # for shapes the copy-free paths cannot express.
        cols = min(_MAX_COLS, _round_up(total, 128))
        padded_total = _cdiv(total, cols) * cols
        flat = jnp.pad(flat, (0, padded_total - total))
    rows = padded_total // cols

    tile_target_bytes, min_steps = _device_hints()
    tile_rows = _pick_tile_rows(rows, sub, cols, itemsize, tile_target_bytes, min_steps)
    # Last block may be partial (rows need not divide by tile_rows): OOB rows of
    # the final block are masked on the store, so no row padding is needed.
    grid = (_cdiv(rows, tile_rows),)

    slab = flat.reshape(rows, cols)
    tile_bytes = tile_rows * cols * itemsize
    # in + out, double-buffered, plus headroom; stays well inside every chip's
    # VMEM (<= 48 MiB even on v7x's 64 MiB per-core VMEM).
    vmem_limit = int(min(48 * _MIB, max(16 * _MIB, 4 * tile_bytes + 8 * _MIB)))

    out = pl.pallas_call(
        _edm_weighting_kernel,
        out_shape=jax.ShapeDtypeStruct((rows, cols), dtype),
        grid_spec=pltpu.PrefetchScalarGridSpec(
            num_scalar_prefetch=0,
            grid=grid,
            in_specs=[pl.BlockSpec((tile_rows, cols), lambda i: (i, 0))],
            out_specs=pl.BlockSpec((tile_rows, cols), lambda i: (i, 0)),
        ),
        compiler_params=pltpu.CompilerParams(
            dimension_semantics=("parallel",),
            vmem_limit_bytes=vmem_limit,
        ),
    )(slab)

    if padded_total != total:
        out = out.reshape(-1)[:total]  # fallback path only
    return out.reshape(orig_shape)


def edm_weighting_ref(gamma: jax.Array) -> jax.Array:
    data_part = -((gamma - MEAN) ** 2) / (2.0 * SCALE * SCALE)
    pdf = jnp.exp(CONSTANT + data_part)
    return pdf * (jnp.exp(-gamma) + 0.25)


if __name__ == "__main__":
    key = jax.random.PRNGKey(0)

    # Typical log-SNR range; lane-aligned total -> fully copy-free path.
    gamma = jax.random.uniform(
        key, (2, 4, 16, 16), dtype=jnp.float32, minval=-10.0, maxval=10.0
    )
    out = jax.block_until_ready(edm_weighting(gamma))
    ref = edm_weighting_ref(gamma)
    assert out.shape == ref.shape and out.dtype == ref.dtype
    assert jnp.allclose(out, ref, rtol=1e-5, atol=1e-6), "mismatch vs reference (aligned)"

    # Non-128-aligned total (1500 elems): exercises the copy-free divisor path
    # (cols=750, full-dim block, no pad and no output slice).
    key2 = jax.random.split(key)[0]
    gamma2 = jax.random.uniform(
        key2, (3, 5, 100), dtype=jnp.float32, minval=-10.0, maxval=10.0
    )
    out2 = jax.block_until_ready(edm_weighting(gamma2))
    ref2 = edm_weighting_ref(gamma2)
    assert out2.shape == ref2.shape and out2.dtype == ref2.dtype
    assert jnp.allclose(out2, ref2, rtol=1e-5, atol=1e-6), "mismatch vs reference (ragged)"

    print("KERNEL_OK")
</pallas_src>

<mosaic_0001>
module attributes {stable_mosaic.version = 11 : i64} {
  func.func @_edm_weighting_kernel(%arg0: i32, %arg1: memref<2x1024xf32, #tpu.memory_space<vmem>>, %arg2: memref<2x1024xf32, #tpu.memory_space<vmem>>) attributes {dimension_semantics = [#tpu.dimension_semantics<parallel>], iteration_bounds = array<i64: 1>, scalar_prefetch = 0 : i64, scratch_operands = 0 : i64, tpu.core_type = #tpu.core_type<tc>, window_params = [{transform_indices = @transform_0, window_bounds = array<i64: 2, 1024>}, {transform_indices = @transform_1, window_bounds = array<i64: 2, 1024>}]} {
    %c0 = arith.constant 0 : index
    %c0_0 = arith.constant 0 : index
    %0 = vector.load %arg1[%c0, %c0_0] : memref<2x1024xf32, #tpu.memory_space<vmem>>, vector<2x1024xf32>
    %cst = arith.constant 2.400000e+00 : f32
    %1 = vector.broadcast %cst : f32 to vector<2x1024xf32>
    %2 = arith.subf %0, %1 : vector<2x1024xf32>
    %3 = arith.mulf %2, %2 : vector<2x1024xf32>
    %cst_1 = arith.constant -0.0868055522 : f32
    %4 = vector.broadcast %cst_1 : f32 to vector<2x1024xf32>
    %5 = arith.mulf %3, %4 : vector<2x1024xf32>
    %cst_2 = arith.constant -1.79440725 : f32
    %6 = vector.broadcast %cst_2 : f32 to vector<2x1024xf32>
    %7 = arith.addf %6, %5 : vector<2x1024xf32>
    %8 = math.exp %7 : vector<2x1024xf32>
    %cst_3 = arith.constant 0.000000e+00 : f32
    %9 = vector.broadcast %cst_3 : f32 to vector<2x1024xf32>
    %10 = arith.subf %9, %0 : vector<2x1024xf32>
    %11 = math.exp %10 : vector<2x1024xf32>
    %cst_4 = arith.constant 2.500000e-01 : f32
    %12 = vector.broadcast %cst_4 : f32 to vector<2x1024xf32>
    %13 = arith.addf %11, %12 : vector<2x1024xf32>
    %14 = arith.mulf %8, %13 : vector<2x1024xf32>
    %c0_5 = arith.constant 0 : index
    %c0_6 = arith.constant 0 : index
    %15 = vector.load %arg2[%c0_5, %c0_6] : memref<2x1024xf32, #tpu.memory_space<vmem>>, vector<2x1024xf32>
    tpu.vector_store %arg2[%c0_5, %c0_6], %14 {strides = array<i32>} : memref<2x1024xf32, #tpu.memory_space<vmem>>, vector<2x1024xf32>,
    return
  }
  func.func @transform_0(%arg0: i32) -> (i32, i32) {
    %c0_i32 = arith.constant 0 : i32
    %c0_i32_0 = arith.constant 0 : i32
    return %arg0, %c0_i32 : i32, i32
  }
  func.func @transform_1(%arg0: i32) -> (i32, i32) {
    %c0_i32 = arith.constant 0 : i32
    %c0_i32_0 = arith.constant 0 : i32
    return %arg0, %c0_i32 : i32, i32
  }
}

</mosaic_0001>

<bundles_post_ra>
// kernel: tpu_custom_call.1
= control target key start
LH: loop header
LB: loop body
LE: loop exit
PB: predicated region body
PF: predicated region fallthrough
CT: control target
= control target key end

     0   :  { %6 = vsyncpa [#allocation3], 0  ;;  %s158_s0 = inlined_call_operand.hbm [shape: f32[2,1024], index: 0, kind: input, shape index: {}]   ;;  %s159_s1 = inlined_call_operand.hbm [shape: f32[2,1024], index: 1, kind: output, shape index: {}]  }
   0x1   :  { %7 = vsyncpa [#allocation4], 0  ;;  %s122_s6 = smov [#allocation2]   ;;  %s74_s10 = scalar_lea.hbm %s158_s0, 256 }
   0x2   :  { %s14_s7 = sshll.u32 %s122_s6, 4  ;;  %p75_p0 = scmp.ne.s32.totalorder %s158_s0, %s74_s10  ;;  %s15_s7 = int_to_ptr.vmem [resolvable:$true] %s14_s7 }
   0x3   :  { %p78_p1 = scmp.lt.u32.totalorder %s74_s10, %s158_s0 }
   0x5   :  { %p80_p2 = pnand %p78_p1, %p75_p0 }
   0x7   :  { %83 = shalt.err (!%p80_p2)
}
   0x8   :  { %s84_s15 = scalar_lea.vmem %s15_s7, 256  ;;  %p89_p4 = scmp.lt.s32.totalorder %s15_s7, %s15_s7 }
   0x9   :  { %p85_p3 = scmp.ne.s32.totalorder %s15_s7, %s84_s15  ;;  %p90_p5 = scmp.lt.s32.totalorder %s84_s15, %s84_s15 }
   0xb   :  { %p91_p6 = por %p90_p5, %p89_p4 }
   0xd   :  { %p92_p7 = pnand %p91_p6, %p85_p3 }
   0xf   :  { %95 = shalt.err (!%p92_p7)
}
  0x10   :  { %17 = dma.hbm_to_vmem [thread:$0]  %s158_s0, 256, %s15_s7, [#allocation3]  }
  0x11   :  { %118 = dma.done.wait [#allocation3], 256  }
  0x12   :  { %119 = vsyncadd [#allocation3], 4294967040  ;;  %v21_v0 = vld [vmem:[#allocation2] sm:$0xff]  ;;  %v22_v1 = vld [vmem:[#allocation2 + $0x8] sm:$0xff]  ;;  %s123_s0 = smov [#allocation5]  }
  0x13   :  { %v62_v2 = vadd.f32 -2.4, %v21_v0  ;;  %v35_v3 = vsub.f32 0.0, %v21_v0  ;;  %v63_v4 = vadd.f32 -2.4, %v22_v1  ;;  %v36_v5 = vsub.f32 0.0, %v22_v1 }
  0x14   :  { %s53_s18 = sshll.u32 %s123_s0, 4  ;;  %s54_s18 = int_to_ptr.vmem [resolvable:$true] %s53_s18 }
  0x15   :  { %v25_v6 = vmul.f32 %v62_v2, %v62_v2  ;;  %v37_v7 = vmul.f32 1.442695, %v35_v3  ;;  %v26_v8 = vmul.f32 %v63_v4, %v63_v4  ;;  %v39_v9 = vmul.f32 1.442695, %v36_v5  ;;  %s96_s19 = scalar_lea.vmem %s54_s18, 256  ;;  %p101_p9 = scmp.lt.s32.totalorder %s54_s18, %s54_s18 }
  0x16   :  { %p97_p8 = scmp.ne.s32.totalorder %s54_s18, %s96_s19  ;;  %p102_p10 = scmp.lt.s32.totalorder %s96_s19, %s96_s19 }
  0x17   :  { %v27_v10 = vmul.f32 -0.08680555, %v25_v6  ;;  %66 = vpow2.f32 %v37_v7  ;;  %v28_v11 = vmul.f32 -0.08680555, %v26_v8 }
  0x18   :  { %68 = vpow2.f32 %v39_v9  ;;  %p103_p11 = por %p102_p10, %p101_p9 }
  0x19   :  { %v29_v12 = vadd.f32 -1.7944072, %v27_v10  ;;  %v30_v13 = vadd.f32 -1.7944072, %v28_v11 }
  0x1a   :  { %p104_p12 = pnand %p103_p11, %p97_p8 }
  0x1b   :  { %v31_v14 = vmul.f32 1.442695, %v29_v12  ;;  %v33_v15 = vmul.f32 1.442695, %v30_v13 }
  0x1d   :  { %70 = vpow2.f32 %v31_v14 }
  0x1e   :  { %72 = vpow2.f32 %v33_v15 }
  0x21   :  { %v67_v16 = vpop.eup %66 }
  0x22   :  { %v69_v17 = vpop.eup %68  ;;  %v41_v18 = vadd.f32 0.25, %v67_v16 }
  0x23   :  { %v42_v19 = vadd.f32 0.25, %v69_v17 }
  0x27   :  { %v71_v20 = vpop.eup %70 }
  0x28   :  { %v73_v21 = vpop.eup %72  ;;  %v43_v22 = vmul.f32 %v71_v20, %v41_v18 }
  0x29   :  { %v44_v23 = vmul.f32 %v73_v21, %v42_v19 }
  0x2a   :  { %45 = vst [vmem:[#allocation5] sm:$0xff] %v43_v22 }
  0x2b   :  { %46 = vst [vmem:[#allocation5 + $0x8] sm:$0xff] %v44_v23 }
  0x2c   :  { %107 = shalt.err (!%p104_p12)
}
  0x2d   :  { %s108_s22 = scalar_lea.hbm %s159_s1, 256 }
  0x2e   :  { %p109_p13 = scmp.ne.s32.totalorder %s159_s1, %s108_s22  ;;  %p112_p0 = scmp.lt.u32.totalorder %s108_s22, %s159_s1 }
  0x30   :  { %p114_p1 = pnand %p112_p0, %p109_p13 }
  0x32   :  { %117 = shalt.err (!%p114_p1)
}
  0x33   :  { %56 = dma.vmem_to_hbm [thread:$0]  %s54_s18, 256, %s159_s1, [#allocation4]  }
  0x34   :  { %120 = dma.done.wait [#allocation4], 256  }
  0x35   :  { %121 = vsyncadd [#allocation4], 4294967040 }
  0x36   :  { %60 = vsyncpa [#allocation3], 1 }
  0x37   :  { %61 = vsyncpa [#allocation4], 1 }

</bundles_post_ra>
